<compile_context>
chip_gen: v6e
topology: v6e:2x2x1
jax: 0.10.0
libtpu: 0.0.40
codegen_flags: <defaults>
</compile_context>

<pallas_src>
import functools
import math

import jax
import jax.numpy as jnp
from jax.experimental import pallas as pl
from jax.experimental.pallas import tpu as pltpu

_LANE = 128
_HALF_LOG_2PI = 0.5 * math.log(2.0 * math.pi)


def _round_up(x: int, m: int) -> int:
    return ((x + m - 1) // m) * m


def _cdiv(a: int, b: int) -> int:
    return (a + b - 1) // b


def _vmem_limit_bytes() -> int:
    """Generation-aware VMEM limit: ~75% of physical, clamped to [32, 100] MiB."""
    cap = None
    try:
        info = pltpu.get_tpu_info()
        cap = getattr(info, "vmem_capacity_bytes", None)
    except Exception:
        cap = None
    if not cap:
        cap = 64 * 1024 * 1024  # conservative fallback (v7x physical size)
    return int(min(max((cap * 3) // 4, 32 * 1024 * 1024), 100 * 1024 * 1024))


def _make_sac_kernel(num_hidden: int, state_dim: int, action_dim: int,
                     action_bound: float, pad_x: bool):
    """Kernel closes over static layer count, true widths and action bound."""

    def kernel(x_ref, eps_ref, *refs):
        # refs = (w0, b0, ..., w_mu, b_mu, w_std, b_std, action_out, logp_out[, xpad])
        if pad_x:
            params, act_ref, logp_ref, xpad_ref = (
                refs[:-3], refs[-3], refs[-2], refs[-1])
            # Zero-extend the true-width state block to the lane-padded width in
            # VMEM.  The scratch is re-zeroed every step: it persists across grid
            # steps and each megacore core starts at a different program_id, so a
            # program_id==0 guard would be wrong on v7x.
            xpad_ref[...] = jnp.zeros_like(xpad_ref)
            xpad_ref[:, :state_dim] = x_ref[...]
            h = xpad_ref[...]                             # bf16 (TB, S_pad)
        else:
            params, act_ref, logp_ref = refs[:-2], refs[-2], refs[-1]
            h = x_ref[...]                                # bf16 (TB, S_pad)

        for i in range(num_hidden):                       # Linear + ReLU
            w = params[2 * i][...]                        # bf16 (in_p, out_p)
            b = params[2 * i + 1][...]                    # f32  (1, out_p)
            h = jnp.dot(h, w, preferred_element_type=jnp.float32) + b
            h = jnp.maximum(h, 0.0).astype(jnp.bfloat16)

        w_mu, b_mu = params[2 * num_hidden][...], params[2 * num_hidden + 1][...]
        w_sd, b_sd = params[2 * num_hidden + 2][...], params[2 * num_hidden + 3][...]

        mean = jnp.dot(h, w_mu, preferred_element_type=jnp.float32) + b_mu
        pre = jnp.dot(h, w_sd, preferred_element_type=jnp.float32) + b_sd

        # Drop the padded action lanes: the whole tail (softplus/tanh/log) and
        # both output stores run at the true action width.
        mean = mean[:, :action_dim]
        pre = jnp.clip(pre[:, :action_dim], -100.0, 650.0)
        # numerically stable softplus (matches F.softplus) + 3e-5
        std = jnp.maximum(pre, 0.0) + jnp.log(1.0 + jnp.exp(-jnp.abs(pre))) + 3e-5

        eps = eps_ref[...]                                # f32 (TB, action_dim)
        sample = mean + std * eps                         # rsample
        # Normal(mean, std).log_prob(sample); (sample - mean)/std == eps
        logp = -0.5 * (eps * eps) - jnp.log(std) - _HALF_LOG_2PI
        action = jnp.tanh(sample)
        # the module applies tanh to `action` again inside the correction term
        logp = logp - jnp.log(1.0 - jnp.square(jnp.tanh(action)) + 1e-7)

        act_ref[...] = (action * jnp.float32(action_bound)).astype(act_ref.dtype)
        # in-kernel reduction over the (true-width) action lanes -> (TB, 1)
        logp_ref[...] = jnp.sum(logp, axis=1, keepdims=True)

    return kernel


def sac_policy_forward(x, params, eps, action_bound: float = 1.0):
    """Fused SACPolicyNet forward on TPU via one pallas_call.

    x      : (batch, state_dim) f32
    params : [w0, b0, ..., w_{H-1}, b_{H-1}, w_mu, b_mu, w_std, b_std]
             w: (in_dim, out_dim) f32 (transposed vs. torch.nn.Linear), b: (out_dim,) f32
    eps    : (batch, action_dim) f32 standard-normal noise for rsample
    returns: (action (batch, action_dim), log_prob (batch, 1))
    """
    num_layers = len(params) // 2            # hidden layers + fc_mu + fc_std
    num_hidden = num_layers - 2
    batch, state_dim = x.shape
    action_dim = params[-1].shape[-1]

    S_pad = _round_up(state_dim, _LANE)
    pad_x = S_pad != state_dim

    # --- pad + cast parameters (matmul operands -> bf16, f32 biases) ---------
    padded_params = []
    widths = [S_pad]
    for li in range(num_layers):
        w = params[2 * li]
        b = params[2 * li + 1].reshape(1, -1)
        in_d, out_d = w.shape
        in_p, out_p = _round_up(in_d, _LANE), _round_up(out_d, _LANE)
        widths.append(out_p)
        w_p = jnp.pad(w.astype(jnp.bfloat16), ((0, in_p - in_d), (0, out_p - out_d)))
        b_p = jnp.pad(b.astype(jnp.float32), ((0, 0), (0, out_p - out_d)))
        padded_params += [w_p, b_p]

    # --- balanced batch tiling; >= 2 tiles for v7x megacore when batch allows -
    max_width = max(widths)
    tile_cap = 1024 if max_width >= 1024 else 2048   # keep f32 accumulators in VMEM on v7x
    n_tiles = max(1, _cdiv(batch, tile_cap))
    if n_tiles == 1 and batch >= 256:
        n_tiles = 2                                   # give both v7x TensorCores work
    TB = _round_up(_cdiv(batch, n_tiles), 16)
    B_pad = TB * n_tiles

    # --- batch-only padding of the streamed inputs (no lane padding) ---------
    x_p = jnp.pad(x.astype(jnp.bfloat16), ((0, B_pad - batch), (0, 0)))
    eps_p = jnp.pad(eps.astype(jnp.float32), ((0, B_pad - batch), (0, 0)))

    kernel = _make_sac_kernel(num_hidden, state_dim, action_dim, action_bound, pad_x)

    grid = (n_tiles,)
    in_specs = [
        pl.BlockSpec((TB, state_dim), lambda i: (i, 0)),    # x: streamed, true width
        pl.BlockSpec((TB, action_dim), lambda i: (i, 0)),   # eps: streamed, true width
    ] + [
        pl.BlockSpec(p.shape, lambda i: (0, 0))             # weights/biases: VMEM-resident
        for p in padded_params
    ]
    out_specs = (
        pl.BlockSpec((TB, action_dim), lambda i: (i, 0)),   # action, true width
        pl.BlockSpec((TB, 1), lambda i: (i, 0)),            # log-prob, reduced in-kernel
    )
    out_shape = (
        jax.ShapeDtypeStruct((B_pad, action_dim), jnp.float32),
        jax.ShapeDtypeStruct((B_pad, 1), jnp.float32),
    )
    scratch_shapes = [pltpu.VMEM((TB, S_pad), jnp.bfloat16)] if pad_x else []

    # Advisory cost estimate so XLA can schedule/overlap this custom call.
    flops = 2 * B_pad * sum(int(p.shape[0]) * int(p.shape[1]) for p in padded_params[::2])
    bytes_accessed = int(
        x_p.size * x_p.dtype.itemsize
        + eps_p.size * eps_p.dtype.itemsize
        + sum(int(p.size) * p.dtype.itemsize for p in padded_params)
        + B_pad * (action_dim + 1) * 4)
    cost = pl.CostEstimate(flops=int(flops),
                           transcendentals=int(B_pad * action_dim * 6),
                           bytes_accessed=bytes_accessed)

    action_p, logp_p = pl.pallas_call(
        kernel,
        out_shape=out_shape,
        grid=grid,
        in_specs=in_specs,
        out_specs=out_specs,
        scratch_shapes=scratch_shapes,
        compiler_params=pltpu.CompilerParams(
            dimension_semantics=("parallel",),       # batch tiles independent -> megacore
            vmem_limit_bytes=_vmem_limit_bytes(),    # ~48 MiB v7x, ~96 MiB v5e/v6e
        ),
        cost_estimate=cost,
    )(x_p, eps_p, *padded_params)

    # outputs are already at the true action width; only the batch pad is sliced
    return action_p[:batch], logp_p[:batch]


def init_params(key, state_dim, hidden_layers_dim, action_dim):
    """Deterministic init mimicking torch.nn.Linear default (uniform +/- 1/sqrt(fan_in))."""
    params = []
    in_dims = [state_dim] + list(hidden_layers_dim[:-1])
    out_dims = list(hidden_layers_dim)
    layer_io = list(zip(in_dims, out_dims)) + [(hidden_layers_dim[-1], action_dim)] * 2
    for fan_in, fan_out in layer_io:
        key, kw, kb = jax.random.split(key, 3)
        bound = 1.0 / math.sqrt(float(fan_in))
        w = jax.random.uniform(kw, (fan_in, fan_out), jnp.float32, -bound, bound)
        b = jax.random.uniform(kb, (fan_out,), jnp.float32, -bound, bound)
        params += [w, b]
    return params


def reference_forward(x, params, eps, action_bound):
    """Pure-JAX f32 mirror of SACPolicyNet.forward (same injected eps)."""
    num_layers = len(params) // 2
    num_hidden = num_layers - 2
    h = x
    for i in range(num_hidden):
        h = jnp.maximum(h @ params[2 * i] + params[2 * i + 1], 0.0)
    mean = h @ params[2 * num_hidden] + params[2 * num_hidden + 1]
    pre = jnp.clip(h @ params[2 * num_hidden + 2] + params[2 * num_hidden + 3],
                   -100.0, 650.0)
    std = jax.nn.softplus(pre) + 3e-5
    sample = mean + std * eps
    logp = -0.5 * eps ** 2 - jnp.log(std) - 0.5 * jnp.log(2.0 * jnp.pi)
    action = jnp.tanh(sample)
    logp = logp - jnp.log(1.0 - jnp.tanh(action) ** 2 + 1e-7)
    logp = jnp.sum(logp, axis=1, keepdims=True)
    return action * action_bound, logp


if __name__ == "__main__":
    batch = 2
    state_dim = 16
    hidden_layers_dim = [32, 32]
    action_dim = 4
    action_bound = 2.0

    key = jax.random.PRNGKey(0)
    key, kx, keps = jax.random.split(key, 3)
    x = jax.random.normal(kx, (batch, state_dim), jnp.float32)
    eps = jax.random.normal(keps, (batch, action_dim), jnp.float32)
    params = init_params(key, state_dim, hidden_layers_dim, action_dim)

    fwd = jax.jit(functools.partial(sac_policy_forward, action_bound=action_bound))
    action, log_prob = fwd(x, params, eps)
    action = jax.block_until_ready(action)
    log_prob = jax.block_until_ready(log_prob)

    ref_action, ref_logp = reference_forward(x, params, eps, action_bound)
    assert action.shape == (batch, action_dim)
    assert log_prob.shape == (batch, 1)
    # bf16 matmul operands vs f32 reference -> moderate tolerance
    assert jnp.allclose(action, ref_action, atol=5e-2, rtol=5e-2), (action, ref_action)
    assert jnp.allclose(log_prob, ref_logp, atol=5e-2, rtol=5e-2), (log_prob, ref_logp)

    print("KERNEL_OK")
</pallas_src>

<mosaic_0001>
module attributes {stable_mosaic.version = 11 : i64} {
  func.func @kernel(%arg0: i32, %arg1: memref<16x16xbf16, #tpu.memory_space<vmem>>, %arg2: memref<16x4xf32, #tpu.memory_space<vmem>>, %arg3: memref<128x128xbf16, #tpu.memory_space<vmem>>, %arg4: memref<1x128xf32, #tpu.memory_space<vmem>>, %arg5: memref<128x128xbf16, #tpu.memory_space<vmem>>, %arg6: memref<1x128xf32, #tpu.memory_space<vmem>>, %arg7: memref<128x128xbf16, #tpu.memory_space<vmem>>, %arg8: memref<1x128xf32, #tpu.memory_space<vmem>>, %arg9: memref<128x128xbf16, #tpu.memory_space<vmem>>, %arg10: memref<1x128xf32, #tpu.memory_space<vmem>>, %arg11: memref<16x4xf32, #tpu.memory_space<vmem>>, %arg12: memref<16x1xf32, #tpu.memory_space<vmem>>, %arg13: memref<16x128xbf16, #tpu.memory_space<vmem>>) attributes {dimension_semantics = [#tpu.dimension_semantics<parallel>], iteration_bounds = array<i64: 1>, scalar_prefetch = 0 : i64, scratch_operands = 1 : i64, tpu.core_type = #tpu.core_type<tc>, window_params = [{transform_indices = @transform_0, window_bounds = array<i64: 16, 16>}, {transform_indices = @transform_1, window_bounds = array<i64: 16, 4>}, {pipeline_mode = #tpu.pipeline_mode<synchronous>, transform_indices = @transform_2, window_bounds = array<i64: 128, 128>}, {pipeline_mode = #tpu.pipeline_mode<synchronous>, transform_indices = @transform_3, window_bounds = array<i64: 1, 128>}, {pipeline_mode = #tpu.pipeline_mode<synchronous>, transform_indices = @transform_4, window_bounds = array<i64: 128, 128>}, {pipeline_mode = #tpu.pipeline_mode<synchronous>, transform_indices = @transform_5, window_bounds = array<i64: 1, 128>}, {pipeline_mode = #tpu.pipeline_mode<synchronous>, transform_indices = @transform_6, window_bounds = array<i64: 128, 128>}, {pipeline_mode = #tpu.pipeline_mode<synchronous>, transform_indices = @transform_7, window_bounds = array<i64: 1, 128>}, {pipeline_mode = #tpu.pipeline_mode<synchronous>, transform_indices = @transform_8, window_bounds = array<i64: 128, 128>}, {pipeline_mode = #tpu.pipeline_mode<synchronous>, transform_indices = @transform_9, window_bounds = array<i64: 1, 128>}, {transform_indices = @transform_10, window_bounds = array<i64: 16, 4>}, {transform_indices = @transform_11, window_bounds = array<i64: 16, 1>}]} {
    %cst = arith.constant 0.000000e+00 : bf16
    %0 = vector.broadcast %cst : bf16 to vector<16x128xbf16>
    %c0 = arith.constant 0 : index
    %c0_0 = arith.constant 0 : index
    %1 = vector.load %arg13[%c0, %c0_0] : memref<16x128xbf16, #tpu.memory_space<vmem>>, vector<16x128xbf16>
    tpu.vector_store %arg13[%c0, %c0_0], %0 {strides = array<i32>} : memref<16x128xbf16, #tpu.memory_space<vmem>>, vector<16x128xbf16>,
    %c0_1 = arith.constant 0 : index
    %c0_2 = arith.constant 0 : index
    %2 = vector.load %arg1[%c0_1, %c0_2] : memref<16x16xbf16, #tpu.memory_space<vmem>>, vector<16x16xbf16>
    %c0_3 = arith.constant 0 : index
    %c0_4 = arith.constant 0 : index
    %3 = vector.load %arg13[%c0_3, %c0_4] : memref<16x128xbf16, #tpu.memory_space<vmem>>, vector<16x16xbf16>
    tpu.vector_store %arg13[%c0_3, %c0_4], %2 {strides = array<i32>} : memref<16x128xbf16, #tpu.memory_space<vmem>>, vector<16x16xbf16>,
    %c0_5 = arith.constant 0 : index
    %c0_6 = arith.constant 0 : index
    %4 = vector.load %arg13[%c0_5, %c0_6] : memref<16x128xbf16, #tpu.memory_space<vmem>>, vector<16x128xbf16>
    %c0_7 = arith.constant 0 : index
    %c0_8 = arith.constant 0 : index
    %5 = vector.load %arg3[%c0_7, %c0_8] : memref<128x128xbf16, #tpu.memory_space<vmem>>, vector<128x128xbf16>
    %c0_9 = arith.constant 0 : index
    %c0_10 = arith.constant 0 : index
    %6 = vector.load %arg4[%c0_9, %c0_10] : memref<1x128xf32, #tpu.memory_space<vmem>>, vector<1x128xf32>
    %cst_11 = arith.constant dense<0.000000e+00> : vector<16x128xf32>
    %7 = tpu.matmul %4, %5, %cst_11 {dimension_numbers = #tpu.dot_dimension_numbers<[1], [0], [0], [1], [0, 0, 1, 1], [], []>} : vector<16x128xbf16>, vector<128x128xbf16>, vector<16x128xf32> -> vector<16x128xf32>
    %8 = vector.broadcast %6 : vector<1x128xf32> to vector<16x128xf32>
    %9 = arith.addf %7, %8 : vector<16x128xf32>
    %cst_12 = arith.constant 0.000000e+00 : f32
    %10 = vector.broadcast %cst_12 : f32 to vector<16x128xf32>
    %11 = arith.maximumf %9, %10 : vector<16x128xf32>
    %12 = arith.truncf %11 : vector<16x128xf32> to vector<16x128xbf16>
    %c0_13 = arith.constant 0 : index
    %c0_14 = arith.constant 0 : index
    %13 = vector.load %arg5[%c0_13, %c0_14] : memref<128x128xbf16, #tpu.memory_space<vmem>>, vector<128x128xbf16>
    %c0_15 = arith.constant 0 : index
    %c0_16 = arith.constant 0 : index
    %14 = vector.load %arg6[%c0_15, %c0_16] : memref<1x128xf32, #tpu.memory_space<vmem>>, vector<1x128xf32>
    %cst_17 = arith.constant dense<0.000000e+00> : vector<16x128xf32>
    %15 = tpu.matmul %12, %13, %cst_17 {dimension_numbers = #tpu.dot_dimension_numbers<[1], [0], [0], [1], [0, 0, 1, 1], [], []>} : vector<16x128xbf16>, vector<128x128xbf16>, vector<16x128xf32> -> vector<16x128xf32>
    %16 = vector.broadcast %14 : vector<1x128xf32> to vector<16x128xf32>
    %17 = arith.addf %15, %16 : vector<16x128xf32>
    %cst_18 = arith.constant 0.000000e+00 : f32
    %18 = vector.broadcast %cst_18 : f32 to vector<16x128xf32>
    %19 = arith.maximumf %17, %18 : vector<16x128xf32>
    %20 = arith.truncf %19 : vector<16x128xf32> to vector<16x128xbf16>
    %c0_19 = arith.constant 0 : index
    %c0_20 = arith.constant 0 : index
    %21 = vector.load %arg7[%c0_19, %c0_20] : memref<128x128xbf16, #tpu.memory_space<vmem>>, vector<128x128xbf16>
    %c0_21 = arith.constant 0 : index
    %c0_22 = arith.constant 0 : index
    %22 = vector.load %arg8[%c0_21, %c0_22] : memref<1x128xf32, #tpu.memory_space<vmem>>, vector<1x128xf32>
    %c0_23 = arith.constant 0 : index
    %c0_24 = arith.constant 0 : index
    %23 = vector.load %arg9[%c0_23, %c0_24] : memref<128x128xbf16, #tpu.memory_space<vmem>>, vector<128x128xbf16>
    %c0_25 = arith.constant 0 : index
    %c0_26 = arith.constant 0 : index
    %24 = vector.load %arg10[%c0_25, %c0_26] : memref<1x128xf32, #tpu.memory_space<vmem>>, vector<1x128xf32>
    %cst_27 = arith.constant dense<0.000000e+00> : vector<16x128xf32>
    %25 = tpu.matmul %20, %21, %cst_27 {dimension_numbers = #tpu.dot_dimension_numbers<[1], [0], [0], [1], [0, 0, 1, 1], [], []>} : vector<16x128xbf16>, vector<128x128xbf16>, vector<16x128xf32> -> vector<16x128xf32>
    %26 = vector.broadcast %22 : vector<1x128xf32> to vector<16x128xf32>
    %27 = arith.addf %25, %26 : vector<16x128xf32>
    %cst_28 = arith.constant dense<0.000000e+00> : vector<16x128xf32>
    %28 = tpu.matmul %20, %23, %cst_28 {dimension_numbers = #tpu.dot_dimension_numbers<[1], [0], [0], [1], [0, 0, 1, 1], [], []>} : vector<16x128xbf16>, vector<128x128xbf16>, vector<16x128xf32> -> vector<16x128xf32>
    %29 = vector.broadcast %24 : vector<1x128xf32> to vector<16x128xf32>
    %30 = arith.addf %28, %29 : vector<16x128xf32>
    %31 = vector.extract_strided_slice %27 {offsets = [0, 0], sizes = [16, 4], strides = [1, 1]} : vector<16x128xf32> to vector<16x4xf32>
    %32 = vector.extract_strided_slice %30 {offsets = [0, 0], sizes = [16, 4], strides = [1, 1]} : vector<16x128xf32> to vector<16x4xf32>
    %cst_29 = arith.constant -1.000000e+02 : f32
    %cst_30 = arith.constant 6.500000e+02 : f32
    %33 = vector.broadcast %cst_29 : f32 to vector<16x4xf32>
    %34 = arith.maximumf %33, %32 : vector<16x4xf32>
    %35 = vector.broadcast %cst_30 : f32 to vector<16x4xf32>
    %36 = arith.minimumf %35, %34 : vector<16x4xf32>
    %cst_31 = arith.constant 0.000000e+00 : f32
    %37 = vector.broadcast %cst_31 : f32 to vector<16x4xf32>
    %38 = arith.maximumf %36, %37 : vector<16x4xf32>
    %39 = math.absf %36 : vector<16x4xf32>
    %cst_32 = arith.constant 0.000000e+00 : f32
    %40 = vector.broadcast %cst_32 : f32 to vector<16x4xf32>
    %41 = arith.subf %40, %39 : vector<16x4xf32>
    %42 = math.exp %41 : vector<16x4xf32>
    %cst_33 = arith.constant 1.000000e+00 : f32
    %43 = vector.broadcast %cst_33 : f32 to vector<16x4xf32>
    %44 = arith.addf %43, %42 : vector<16x4xf32>
    %45 = math.log %44 : vector<16x4xf32>
    %46 = arith.addf %38, %45 : vector<16x4xf32>
    %cst_34 = arith.constant 3.000000e-05 : f32
    %47 = vector.broadcast %cst_34 : f32 to vector<16x4xf32>
    %48 = arith.addf %46, %47 : vector<16x4xf32>
    %c0_35 = arith.constant 0 : index
    %c0_36 = arith.constant 0 : index
    %49 = vector.load %arg2[%c0_35, %c0_36] : memref<16x4xf32, #tpu.memory_space<vmem>>, vector<16x4xf32>
    %50 = arith.mulf %48, %49 : vector<16x4xf32>
    %51 = arith.addf %31, %50 : vector<16x4xf32>
    %52 = arith.mulf %49, %49 : vector<16x4xf32>
    %cst_37 = arith.constant -5.000000e-01 : f32
    %53 = vector.broadcast %cst_37 : f32 to vector<16x4xf32>
    %54 = arith.mulf %53, %52 : vector<16x4xf32>
    %55 = math.log %48 : vector<16x4xf32>
    %56 = arith.subf %54, %55 : vector<16x4xf32>
    %cst_38 = arith.constant 0.918938517 : f32
    %57 = vector.broadcast %cst_38 : f32 to vector<16x4xf32>
    %58 = arith.subf %56, %57 : vector<16x4xf32>
    %59 = math.tanh %51 : vector<16x4xf32>
    %60 = math.tanh %59 : vector<16x4xf32>
    %61 = arith.mulf %60, %60 : vector<16x4xf32>
    %cst_39 = arith.constant 1.000000e+00 : f32
    %62 = vector.broadcast %cst_39 : f32 to vector<16x4xf32>
    %63 = arith.subf %62, %61 : vector<16x4xf32>
    %cst_40 = arith.constant 1.000000e-07 : f32
    %64 = vector.broadcast %cst_40 : f32 to vector<16x4xf32>
    %65 = arith.addf %63, %64 : vector<16x4xf32>
    %66 = math.log %65 : vector<16x4xf32>
    %67 = arith.subf %58, %66 : vector<16x4xf32>
    %cst_41 = arith.constant 2.000000e+00 : f32
    %68 = vector.broadcast %cst_41 : f32 to vector<16x4xf32>
    %69 = arith.mulf %59, %68 : vector<16x4xf32>
    %c0_42 = arith.constant 0 : index
    %c0_43 = arith.constant 0 : index
    %70 = vector.load %arg11[%c0_42, %c0_43] : memref<16x4xf32, #tpu.memory_space<vmem>>, vector<16x4xf32>
    tpu.vector_store %arg11[%c0_42, %c0_43], %69 {strides = array<i32>} : memref<16x4xf32, #tpu.memory_space<vmem>>, vector<16x4xf32>,
    %cst_44 = arith.constant dense<0.000000e+00> : vector<16xf32>
    %71 = vector.multi_reduction <add>, %67, %cst_44 [1] : vector<16x4xf32> to vector<16xf32>
    %72 = vector.shape_cast %71 : vector<16xf32> to vector<16x1xf32>
    %c0_45 = arith.constant 0 : index
    %c0_46 = arith.constant 0 : index
    %73 = vector.load %arg12[%c0_45, %c0_46] : memref<16x1xf32, #tpu.memory_space<vmem>>, vector<16x1xf32>
    tpu.vector_store %arg12[%c0_45, %c0_46], %72 {strides = array<i32>} : memref<16x1xf32, #tpu.memory_space<vmem>>, vector<16x1xf32>,
    return
  }
  func.func @transform_0(%arg0: i32) -> (i32, i32) {
    %c0_i32 = arith.constant 0 : i32
    %c0_i32_0 = arith.constant 0 : i32
    return %arg0, %c0_i32 : i32, i32
  }
  func.func @transform_1(%arg0: i32) -> (i32, i32) {
    %c0_i32 = arith.constant 0 : i32
    %c0_i32_0 = arith.constant 0 : i32
    return %arg0, %c0_i32 : i32, i32
  }
  func.func @transform_2(%arg0: i32) -> (i32, i32) {
    %c0_i32 = arith.constant 0 : i32
    %c0_i32_0 = arith.constant 0 : i32
    %c0_i32_1 = arith.constant 0 : i32
    return %c0_i32, %c0_i32_0 : i32, i32
  }
  func.func @transform_3(%arg0: i32) -> (i32, i32) {
    %c0_i32 = arith.constant 0 : i32
    %c0_i32_0 = arith.constant 0 : i32
    %c0_i32_1 = arith.constant 0 : i32
    return %c0_i32, %c0_i32_0 : i32, i32
  }
  func.func @transform_4(%arg0: i32) -> (i32, i32) {
    %c0_i32 = arith.constant 0 : i32
    %c0_i32_0 = arith.constant 0 : i32
    %c0_i32_1 = arith.constant 0 : i32
    return %c0_i32, %c0_i32_0 : i32, i32
  }
  func.func @transform_5(%arg0: i32) -> (i32, i32) {
    %c0_i32 = arith.constant 0 : i32
    %c0_i32_0 = arith.constant 0 : i32
    %c0_i32_1 = arith.constant 0 : i32
    return %c0_i32, %c0_i32_0 : i32, i32
  }
  func.func @transform_6(%arg0: i32) -> (i32, i32) {
    %c0_i32 = arith.constant 0 : i32
    %c0_i32_0 = arith.constant 0 : i32
    %c0_i32_1 = arith.constant 0 : i32
    return %c0_i32, %c0_i32_0 : i32, i32
  }
  func.func @transform_7(%arg0: i32) -> (i32, i32) {
    %c0_i32 = arith.constant 0 : i32
    %c0_i32_0 = arith.constant 0 : i32
    %c0_i32_1 = arith.constant 0 : i32
    return %c0_i32, %c0_i32_0 : i32, i32
  }
  func.func @transform_8(%arg0: i32) -> (i32, i32) {
    %c0_i32 = arith.constant 0 : i32
    %c0_i32_0 = arith.constant 0 : i32
    %c0_i32_1 = arith.constant 0 : i32
    return %c0_i32, %c0_i32_0 : i32, i32
  }
  func.func @transform_9(%arg0: i32) -> (i32, i32) {
    %c0_i32 = arith.constant 0 : i32
    %c0_i32_0 = arith.constant 0 : i32
    %c0_i32_1 = arith.constant 0 : i32
    return %c0_i32, %c0_i32_0 : i32, i32
  }
  func.func @transform_10(%arg0: i32) -> (i32, i32) {
    %c0_i32 = arith.constant 0 : i32
    %c0_i32_0 = arith.constant 0 : i32
    return %arg0, %c0_i32 : i32, i32
  }
  func.func @transform_11(%arg0: i32) -> (i32, i32) {
    %c0_i32 = arith.constant 0 : i32
    %c0_i32_0 = arith.constant 0 : i32
    return %arg0, %c0_i32 : i32, i32
  }
}

</mosaic_0001>

<bundles_post_ra>
// kernel: sac_policy_forward.1
= control target key start
LH: loop header
LB: loop body
LE: loop exit
PB: predicated region body
PF: predicated region fallthrough
CT: control target
= control target key end

     0   :  { %v802_v0 = vmov 0.0   ;;  %vm803_vm0 = vmmov 0   ;;  %v804_v2 = vmov 0   ;;  %vm42_vm1 = vcmask 125952   ;;  %s1041_s2 = inlined_call_operand.vmem [shape: bf16[128,128], index: 2, kind: input, shape index: {}]   ;;  %s1042_s0 = inlined_call_operand.vmem [shape: bf16[16,16], index: 0, kind: input, shape index: {}]   ;;  %s1043_s4 = inlined_call_operand.vmem [shape: bf16[128,128], index: 4, kind: input, shape index: {}]   ;;  %s1044_s6 = inlined_call_operand.vmem [shape: bf16[128,128], index: 6, kind: input, shape index: {}]   ;;  %s1045_s8 = inlined_call_operand.vmem [shape: bf16[128,128], index: 8, kind: input, shape index: {}]   ;;  %s1046_s3 = inlined_call_operand.vmem [shape: f32[1,128], index: 3, kind: input, shape index: {}]   ;;  %s1047_s5 = inlined_call_operand.vmem [shape: f32[1,128], index: 5, kind: input, shape index: {}]   ;;  %s1048_s9 = inlined_call_operand.vmem [shape: f32[1,128], index: 9, kind: input, shape index: {}]   ;;  %s1049_s7 = inlined_call_operand.vmem [shape: f32[1,128], index: 7, kind: input, shape index: {}]   ;;  %s1050_s1 = inlined_call_operand.vmem [shape: f32[16,4], index: 1, kind: input, shape index: {}]   ;;  %s1051_s10 = inlined_call_operand.vmem [shape: f32[16,4], index: 10, kind: output, shape index: {0}]   ;;  %s1052_s11 = inlined_call_operand.vmem [shape: f32[16,1], index: 11, kind: output, shape index: {1}]  }
   0x1   :  { %662 = vmatprep.subr.bf16.mxu0 %v802_v0  ;;  %v745_v1 = vld [vmem:[%s1041_s2 + $0x38] sm:$0xff]   ;;  %678 = vmatprep.mubr.msk.bf16.mxu0 %vm803_vm0, %v802_v0  ;;  %38 = vst [vmem:[#allocation2] sm:$0xf] %v804_v2  ;;  %39 = vst [vmem:[#allocation2 + $0x4] sm:$0xf] %v804_v2  ;;  %v746_v3 = vld [vmem:[%s1041_s2 + $0x30] sm:$0xff]  }
   0x2   :  { %682 = vmatprep.subr.bf16.mxu1 %v802_v0  ;;  %698 = vmatprep.mubr.msk.bf16.mxu1 %vm803_vm0, %v802_v0  ;;  %v747_v4 = vld [vmem:[%s1041_s2 + $0x28] sm:$0xff]   ;;  %v40_v5 = vld [vmem:[%s1042_s0] sm:$0xf]  ;;  %v41_v6 = vld [vmem:[%s1042_s0 + $0x4] sm:$0xf]  ;;  %vm567_vm2 = vcmask 31744  }
   0x3   :  { %663 = vmatpush3.bf16.msra.mxu0 %v745_v1  ;;  %43 = vst.msk [vmem:[#allocation2] sm:$0xf] %vm42_vm1, %v40_v5  ;;  %44 = vst.msk [vmem:[#allocation2 + $0x4] sm:$0xf] %vm42_vm1, %v41_v6  ;;  %v754_v7 = vld [vmem:[%s1043_s4 + $0x38] sm:$0xff]   ;;  %v748_v8 = vld [vmem:[%s1041_s2 + $0x20] sm:$0xff]  }
   0x4   :  { %664 = vmatprep.subr.bf16.mxu0 %v802_v0  ;;  %683 = vmatpush3.bf16.msra.mxu1 %v754_v7  ;;  %v755_v9 = vld [vmem:[%s1043_s4 + $0x30] sm:$0xff]   ;;  %v749_v10 = vld [vmem:[%s1041_s2 + $0x18] sm:$0xff]   ;;  %v756_v11 = vld [vmem:[%s1043_s4 + $0x28] sm:$0xff]   ;;  %vm576_vm3 = vcmask 7168  }
   0x5   :  { %684 = vmatprep.subr.bf16.mxu1 %v802_v0  ;;  %v750_v12 = vld [vmem:[%s1041_s2 + $0x10] sm:$0xff]   ;;  %v757_v13 = vld [vmem:[%s1043_s4 + $0x20] sm:$0xff]   ;;  %v751_v14 = vld [vmem:[%s1041_s2 + $0x8] sm:$0xff]  }
   0x6   :  { %v758_v15 = vld [vmem:[%s1043_s4 + $0x18] sm:$0xff]   ;;  %v752_v16 = vld [vmem:[%s1041_s2] sm:$0xff]   ;;  %v759_v18 = vld [vmem:[%s1043_s4 + $0x10] sm:$0xff]  }
   0x7   :  { %665 = vmatpush3.bf16.msra.mxu0 %v746_v3  ;;  %v760_v19 = vld [vmem:[%s1043_s4 + $0x8] sm:$0xff]   ;;  %v761_v20 = vld [vmem:[%s1043_s4] sm:$0xff]   ;;  %v762_v21 = vld [vmem:[%s1044_s6 + $0x38] sm:$0xff]  }
   0x8   :  { %666 = vmatprep.subr.bf16.mxu0 %v802_v0  ;;  %685 = vmatpush3.bf16.msra.mxu1 %v755_v9  ;;  %v764_v22 = vld [vmem:[%s1044_s6 + $0x30] sm:$0xff]   ;;  %v766_v23 = vld [vmem:[%s1044_s6 + $0x28] sm:$0xff]   ;;  %v768_v24 = vld [vmem:[%s1044_s6 + $0x20] sm:$0xff]  }
   0x9   :  { %686 = vmatprep.subr.bf16.mxu1 %v802_v0  ;;  %v770_v25 = vld [vmem:[%s1044_s6 + $0x18] sm:$0xff]   ;;  %v587_v26 = vld [vmem:[%s1046_s3] ss:$0 sm:$0xff]  ;;  %v765_v37 = vld [vmem:[%s1045_s8 + $0x30] sm:$0xff]  }
   0xa   :  { %v753_v17 = vld [vmem:[#allocation2] sm:$0xff]   ;;  %v763_v35 = vld [vmem:[%s1045_s8 + $0x38] sm:$0xff]   ;;  %v767_v38 = vld [vmem:[%s1045_s8 + $0x28] sm:$0xff]  }
   0xb   :  { %667 = vmatpush3.bf16.msra.mxu0 %v747_v4  ;;  %v769_v39 = vld [vmem:[%s1045_s8 + $0x20] sm:$0xff]   ;;  %v771_v40 = vld [vmem:[%s1045_s8 + $0x18] sm:$0xff]   ;;  %v772_v41 = vld [vmem:[%s1044_s6 + $0x10] sm:$0xff]  }
   0xc   :  { %668 = vmatprep.subr.bf16.mxu0 %v802_v0  ;;  %687 = vmatpush3.bf16.msra.mxu1 %v756_v11  ;;  %v773_v42 = vld [vmem:[%s1045_s8 + $0x10] sm:$0xff]   ;;  %v774_v43 = vld [vmem:[%s1044_s6 + $0x8] sm:$0xff]   ;;  %v776_v45 = vld [vmem:[%s1044_s6] sm:$0xff]  }
   0xd   :  { %688 = vmatprep.subr.bf16.mxu1 %v802_v0  ;;  %v775_v44 = vld [vmem:[%s1045_s8 + $0x8] sm:$0xff]   ;;  %v777_v46 = vld [vmem:[%s1045_s8] sm:$0xff]  }
   0xe   :  { %v597_v47 = vld [vmem:[%s1047_s5] ss:$0 sm:$0xff] }
   0xf   :  { %669 = vmatpush3.bf16.msra.mxu0 %v748_v8  ;;  %v615_v57 = vld [vmem:[%s1048_s9] ss:$0 sm:$0xff] }
  0x10   :  { %670 = vmatprep.subr.bf16.mxu0 %v802_v0  ;;  %689 = vmatpush3.bf16.msra.mxu1 %v757_v13 }
  0x11   :  { %690 = vmatprep.subr.bf16.mxu1 %v802_v0 }
  0x13   :  { %671 = vmatpush3.bf16.msra.mxu0 %v749_v10 }
  0x14   :  { %672 = vmatprep.subr.bf16.mxu0 %v802_v0  ;;  %691 = vmatpush3.bf16.msra.mxu1 %v758_v15 }
  0x15   :  { %692 = vmatprep.subr.bf16.mxu1 %v802_v0 }
  0x17   :  { %673 = vmatpush3.bf16.msra.mxu0 %v750_v12 }
  0x18   :  { %674 = vmatprep.subr.bf16.mxu0 %v802_v0  ;;  %693 = vmatpush3.bf16.msra.mxu1 %v759_v18 }
  0x19   :  { %694 = vmatprep.subr.bf16.mxu1 %v802_v0 }
  0x1b   :  { %675 = vmatpush3.bf16.msra.mxu0 %v751_v14 }
  0x1c   :  { %676 = vmatprep.subr.bf16.mxu0 %v802_v0  ;;  %695 = vmatpush3.bf16.msra.mxu1 %v760_v19 }
  0x1d   :  { %696 = vmatprep.subr.bf16.mxu1 %v802_v0 }
  0x1f   :  { %677 = vmatpush3.bf16.msra.mxu0 %v752_v16 }
  0x20   :  { %702 = vmatprep.subr.bf16.mxu0 %v802_v0  ;;  %697 = vmatpush3.bf16.msra.mxu1 %v761_v20 }
  0x21   :  { %722 = vmatprep.subr.bf16.mxu1 %v802_v0 }
  0x22   :  { %679 = vmatmul.mubr.bf16.vlgmr.msra.gmra.mxu0 %v753_v17 }
  0x23   :  { %718 = vmatprep.mubr.msk.bf16.mxu0 %vm803_vm0, %v802_v0  ;;  %703 = vmatpush3.bf16.msra.mxu0 %v762_v21 }
  0x24   :  { %704 = vmatprep.subr.bf16.mxu0 %v802_v0 }
  0x27   :  { %705 = vmatpush3.bf16.msra.mxu0 %v764_v22 }
  0x28   :  { %706 = vmatprep.subr.bf16.mxu0 %v802_v0 }
  0x2b   :  { %707 = vmatpush3.bf16.msra.mxu0 %v766_v23  ;;  %v606_v23 = vld [vmem:[%s1049_s7] ss:$0 sm:$0xff] }
  0x2c   :  { %708 = vmatprep.subr.bf16.mxu0 %v802_v0 }
  0x2f   :  { %709 = vmatpush3.bf16.msra.mxu0 %v768_v24  ;;  %v531_v24 = vld [vmem:[%s1050_s1] sm:$0xff] }
  0x30   :  { %710 = vmatprep.subr.bf16.mxu0 %v802_v0 }
  0x33   :  { %711 = vmatpush3.bf16.msra.mxu0 %v770_v25 }
  0x34   :  { %712 = vmatprep.subr.bf16.mxu0 %v802_v0 }
  0x37   :  { %713 = vmatpush3.bf16.msra.mxu0 %v772_v41 }
  0x38   :  { %714 = vmatprep.subr.bf16.mxu0 %v802_v0 }
  0x3b   :  { %715 = vmatpush3.bf16.msra.mxu0 %v774_v43 }
  0x3c   :  { %716 = vmatprep.subr.bf16.mxu0 %v802_v0 }
  0x3f   :  { %717 = vmatpush3.bf16.msra.mxu0 %v776_v45 }
  0xe2   :  { %v158_v27 = vpop.f32.mrf.mxu0 }
  0xe3   :  { %v159_v29 = vadd.f32 %v587_v26, %v158_v27 }
  0xe4   :  { %v680_v28 = vpop.f32.mrf.mxu0 }
  0xe5   :  { %v165_v33 = vmax.f32 %v159_v29, 0.0 }
  0xe6   :  { %v161_v30 = vpop.f32.mrf.mxu0 }
  0xe7   :  { %v162_v31 = vadd.f32 %v587_v26, %v161_v30 }
  0xe8   :  { %v681_v32 = vpop.f32.mrf.mxu0 }
  0xe9   :  { %v166_v34 = vmax.f32 %v162_v31, 0.0  ;;  %v532_v31 = vld [vmem:[%s1050_s1 + $0x8] sm:$0xff] }
  0xeb   :  { %v167_v36 = vpack.c.bf16 %v166_v34, %v165_v33 }
  0xed   :  { %699 = vmatmul.mubr.bf16.vlgmr.msra.gmra.mxu1 %v167_v36 }
  0xee   :  { %723 = vmatpush3.bf16.msra.mxu1 %v763_v35  ;;  %738 = vmatprep.mubr.msk.bf16.mxu1 %vm803_vm0, %v802_v0 }
  0xef   :  { %724 = vmatprep.subr.bf16.mxu1 %v802_v0 }
  0xf2   :  { %725 = vmatpush3.bf16.msra.mxu1 %v765_v37 }
  0xf3   :  { %726 = vmatprep.subr.bf16.mxu1 %v802_v0 }
  0xf6   :  { %727 = vmatpush3.bf16.msra.mxu1 %v767_v38 }
  0xf7   :  { %728 = vmatprep.subr.bf16.mxu1 %v802_v0 }
  0xfa   :  { %729 = vmatpush3.bf16.msra.mxu1 %v769_v39 }
  0xfb   :  { %730 = vmatprep.subr.bf16.mxu1 %v802_v0 }
  0xfe   :  { %731 = vmatpush3.bf16.msra.mxu1 %v771_v40 }
  0xff   :  { %732 = vmatprep.subr.bf16.mxu1 %v802_v0 }
 0x102   :  { %733 = vmatpush3.bf16.msra.mxu1 %v773_v42 }
 0x103   :  { %734 = vmatprep.subr.bf16.mxu1 %v802_v0 }
 0x106   :  { %735 = vmatpush3.bf16.msra.mxu1 %v775_v44 }
 0x107   :  { %736 = vmatprep.subr.bf16.mxu1 %v802_v0 }
 0x10a   :  { %737 = vmatpush3.bf16.msra.mxu1 %v777_v46 }
 0x1ad   :  { %v273_v48 = vpop.f32.mrf.mxu1 }
 0x1ae   :  { %v274_v50 = vadd.f32 %v597_v47, %v273_v48 }
 0x1af   :  { %v700_v49 = vpop.f32.mrf.mxu1 }
 0x1b0   :  { %v280_v54 = vmax.f32 %v274_v50, 0.0  ;;  %v537_v49 = vmul.f32 %v531_v24, %v531_v24 }
 0x1b1   :  { %v276_v51 = vpop.f32.mrf.mxu1 }
 0x1b2   :  { %v277_v52 = vadd.f32 %v597_v47, %v276_v51  ;;  %v538_v51 = vmul.f32 %v532_v31, %v532_v31 }
 0x1b3   :  { %v701_v53 = vpop.f32.mrf.mxu1 }
 0x1b4   :  { %v281_v55 = vmax.f32 %v277_v52, 0.0  ;;  %v539_v53 = vmul.f32 -0.5, %v537_v49 }
 0x1b6   :  { %v282_v56 = vpack.c.bf16 %v281_v55, %v280_v54  ;;  %v540_v55 = vmul.f32 -0.5, %v538_v51 }
 0x1b8   :  { %719 = vmatmul.mubr.bf16.vlgmr.msra.gmra.mxu0 %v282_v56  ;;  %739 = vmatmul.mubr.bf16.vlgmr.msra.gmra.mxu1 %v282_v56 }
 0x278   :  { %v405_v58 = vpop.f32.mrf.mxu0  ;;  %v500_v59 = vpop.f32.mrf.mxu1 }
 0x279   :  { %v501_v60 = vadd.f32 %v615_v57, %v500_v59  ;;  %v406_v28 = vadd.f32 %v606_v23, %v405_v58 }
 0x27a   :  { %v720_v61 = vpop.f32.mrf.mxu0  ;;  %v740_v62 = vpop.f32.mrf.mxu1 }
 0x27b   :  { %v507_v63 = vmax.f32 %v501_v60, -100.0 }
 0x27c   :  { %v408_v0 = vpop.f32.mrf.mxu0  ;;  %v503_v1 = vpop.f32.mrf.mxu1 }
 0x27d   :  { %v509_v2 = vmin.f32 %v507_v63, 650.0  ;;  %v504_v3 = vadd.f32 %v615_v57, %v503_v1  ;;  %v409_v34 = vadd.f32 %v606_v23, %v408_v0 }
 0x27e   :  { %v721_v4 = vpop.f32.mrf.mxu0  ;;  %v741_v5 = vpop.f32.mrf.mxu1 }
 0x27f   :  { %v513_v6 = vand.u32 2147483647, %v509_v2  ;;  %v508_v7 = vmax.f32 %v504_v3, -100.0  ;;  %v511_v19 = vmax.f32 %v509_v2, 0.0 }
 0x281   :  { %v515_v8 = vsub.f32 0.0, %v513_v6  ;;  %v510_v9 = vmin.f32 %v508_v7, 650.0 }
 0x283   :  { %v517_v10 = vmul.f32 1.442695, %v515_v8  ;;  %v514_v11 = vand.u32 2147483647, %v510_v9  ;;  %v512_v26 = vmax.f32 %v510_v9, 0.0 }
 0x285   :  { %778 = vpow2.f32 %v517_v10  ;;  %v516_v12 = vsub.f32 0.0, %v514_v11 }
 0x287   :  { %v519_v13 = vmul.f32 1.442695, %v516_v12 }
 0x289   :  { %780 = vpow2.f32 %v519_v13 }
 0x292   :  { %v779_v14 = vpop.eup %778 }
 0x293   :  { %v521_v15 = vadd.f32 1.0, %v779_v14 }
 0x295   :  { %782 = vlog2.f32 %v521_v15 }
 0x296   :  { %v781_v16 = vpop.eup %780 }
 0x297   :  { %v522_v17 = vadd.f32 1.0, %v781_v16 }
 0x299   :  { %784 = vlog2.f32 %v522_v17 }
 0x2a2   :  { %v783_v18 = vpop.eup %782 }
 0x2a3   :  { %v524_v20 = vmul.f32 0.6931472, %v783_v18 }
 0x2a5   :  { %v527_v21 = vadd.f32 %v524_v20, %v511_v19 }
 0x2a6   :  { %v785_v22 = vpop.eup %784 }
 0x2a7   :  { %v529_v25 = vadd.f32 3e-05, %v527_v21  ;;  %v526_v27 = vmul.f32 0.6931472, %v785_v22 }
 0x2a9   :  { %v528_v29 = vadd.f32 %v526_v27, %v512_v26  ;;  %v533_v30 = vmul.f32 %v531_v24, %v529_v25 }
 0x2ab   :  { %v530_v32 = vadd.f32 3e-05, %v528_v29  ;;  %v535_v33 = vadd.f32 %v533_v30, %v406_v28 }
 0x2ad   :  { %v534_v35 = vmul.f32 %v532_v31, %v530_v32  ;;  %786 = vtanh.f32 %v535_v33 }
 0x2af   :  { %v536_v36 = vadd.f32 %v534_v35, %v409_v34 }
 0x2b1   :  { %788 = vtanh.f32 %v536_v36 }
 0x2ba   :  { %v787_v37 = vpop.eup %786 }
 0x2bb   :  { %790 = vtanh.f32 %v787_v37  ;;  %v565_v38 = vmul.f32 2.0, %v787_v37 }
 0x2bd   :  { %568 = vst.msk [vmem:[%s1051_s10] sm:$0xff] %vm567_vm2, %v565_v38 }
 0x2be   :  { %v789_v39 = vpop.eup %788 }
 0x2bf   :  { %v566_v40 = vmul.f32 2.0, %v789_v39  ;;  %792 = vtanh.f32 %v789_v39 }
 0x2c0   :  { %794 = vlog2.f32 %v529_v25 }
 0x2c1   :  { %569 = vst.msk [vmem:[%s1051_s10 + $0x8] sm:$0xff] %vm567_vm2, %v566_v40  ;;  %796 = vlog2.f32 %v530_v32 }
 0x2c8   :  { %v791_v41 = vpop.eup %790 }
 0x2c9   :  { %v553_v42 = vmul.f32 %v791_v41, %v791_v41 }
 0x2cb   :  { %v555_v44 = vsub.f32 1.0, %v553_v42 }
 0x2cc   :  { %v793_v43 = vpop.eup %792 }
 0x2cd   :  { %v554_v45 = vmul.f32 %v793_v43, %v793_v43  ;;  %v557_v46 = vadd.f32 1e-07, %v555_v44  ;;  %v795_v50 = vpop.eup %794 }
 0x2ce   :  { %v797_v52 = vpop.eup %796  ;;  %v542_v54 = vmul.f32 0.6931472, %v795_v50 }
 0x2cf   :  { %v556_v47 = vsub.f32 1.0, %v554_v45  ;;  %798 = vlog2.f32 %v557_v46  ;;  %v544_v56 = vmul.f32 0.6931472, %v797_v52 }
 0x2d0   :  { %v545_v57 = vsub.f32 %v539_v53, %v542_v54 }
 0x2d1   :  { %v558_v48 = vadd.f32 1e-07, %v556_v47  ;;  %v546_v59 = vsub.f32 %v540_v55, %v544_v56 }
 0x2d2   :  { %v624_v60 = vadd.f32 -0.9189385, %v545_v57 }
 0x2d3   :  { %800 = vlog2.f32 %v558_v48  ;;  %v625_v0 = vadd.f32 -0.9189385, %v546_v59 }
 0x2dc   :  { %v799_v58 = vpop.eup %798 }
 0x2dd   :  { %v560_v61 = vmul.f32 0.6931472, %v799_v58 }
 0x2df   :  { %v563_v63 = vsub.f32 %v624_v60, %v560_v61 }
 0x2e0   :  { %v801_v62 = vpop.eup %800 }
 0x2e1   :  { %v562_v1 = vmul.f32 0.6931472, %v801_v62  ;;  %v570_v2 = vsel %vm567_vm2, %v563_v63, 0.0 }
 0x2e2   :  { %571 = vadd.xlane.f32.xlu0 %v570_v2 }
 0x2e3   :  { %v564_v3 = vsub.f32 %v625_v0, %v562_v1 }
 0x2e5   :  { %v573_v4 = vsel %vm567_vm2, %v564_v3, 0.0 }
 0x2e6   :  { %574 = vadd.xlane.f32.xlu0 %v573_v4 }
 0x36b   :  { %v572_v5 = vpop.xlane.xlu0 %571 }
 0x36c   :  { %577 = vst.msk [vmem:[%s1052_s11] sm:$0xff] %vm576_vm3, %v572_v5 }
 0x36f   :  { %v575_v6 = vpop.xlane.xlu0 %574 }
 0x370   :  { %578 = vst.msk [vmem:[%s1052_s11 + $0x8] sm:$0xff] %vm576_vm3, %v575_v6 }

</bundles_post_ra>
